<compile_context>
chip_gen: v7x
topology: tpu7x:2x2x1
jax: 0.10.0
libtpu: 0.0.40
codegen_flags: <defaults>
</compile_context>

<pallas_src>
import functools

import jax
import jax.numpy as jnp
from jax.experimental import pallas as pl
from jax.experimental.pallas import tpu as pltpu

LN_EPS = 1e-5                    # torch.nn.LayerNorm default
SQRT_2_OVER_PI = 0.7978845608028654
INV_SQRT2 = 0.7071067811865476


def _gelu(x, approx):
    if approx:
        # tanh approximation -> EUP slot (co-issues with MXU/VPU work)
        return 0.5 * x * (1.0 + jnp.tanh(SQRT_2_OVER_PI * (x + 0.044715 * x * x * x)))
    # torch.nn.GELU() default: exact erf formulation
    return 0.5 * x * (1.0 + jax.lax.erf(x * INV_SQRT2))


def _round_up(n, m):
    return ((n + m - 1) // m) * m


@functools.lru_cache(maxsize=None)
def _vmem_capacity_bytes():
    """Physical VMEM of the local chip generation (conservative fallback)."""
    try:
        info = pltpu.get_tpu_info()
        cap = getattr(info, "vmem_capacity_bytes", None)
        if cap:
            return int(cap)
    except Exception:
        pass
    return 64 << 20  # v7x per-core VMEM; safe lower bound for any generation


def _probe_kernel(x_ref, o_ref):
    o_ref[...] = x_ref[...]


@functools.lru_cache(maxsize=None)
def _single_buffer_supported():
    """Feature-detect pipeline_mode=pl.Buffered(1) by lowering a tiny kernel once.

    This replaces the previous broad try/except around the *real* kernel call,
    so genuine compile/VMEM errors in the MLP kernel are never masked.
    """
    if not hasattr(pl, "Buffered"):
        return False
    try:
        spec = pl.BlockSpec((8, 128), lambda i: (0, 0), pipeline_mode=pl.Buffered(1))
        fn = pl.pallas_call(
            _probe_kernel,
            out_shape=jax.ShapeDtypeStruct((8, 128), jnp.float32),
            grid_spec=pltpu.PrefetchScalarGridSpec(
                num_scalar_prefetch=0,
                grid=(1,),
                in_specs=[spec],
                out_specs=pl.BlockSpec((8, 128), lambda i: (0, 0)),
            ),
        )
        jax.block_until_ready(fn(jnp.zeros((8, 128), jnp.float32)))
        return True
    except Exception:
        return False


def mlp_kernel(x_ref, w1_ref, b1_ref, w2_ref, b2_ref, o_ref, xn_ref, acc_ref, *,
               d_real, approx_gelu, compute_dtype):
    """Grid = (row blocks, hidden-dim chunks); hidden axis is the reduction axis."""
    k = pl.program_id(1)
    nk = pl.num_programs(1)

    # --- per-row-block init: fused single-pass LayerNorm (lane padding is zero) ---
    @pl.when(k == 0)
    def _ln_init():
        x_in = x_ref[...].astype(jnp.float32)
        inv_d = 1.0 / d_real
        s1 = jnp.sum(x_in, axis=-1, keepdims=True)
        s2 = jnp.sum(x_in * x_in, axis=-1, keepdims=True)
        mu = s1 * inv_d
        var = jnp.maximum(s2 * inv_d - mu * mu, 0.0)
        xn_ref[...] = ((x_in - mu) * jax.lax.rsqrt(var + LN_EPS)).astype(xn_ref.dtype)
        acc_ref[...] = jnp.zeros_like(acc_ref)

    # --- Linear1 chunk + GELU (cast to compute dtype immediately), Linear2 accumulate ---
    h = jnp.dot(xn_ref[...], w1_ref[...],
                preferred_element_type=jnp.float32) + b1_ref[...]
    h = _gelu(h, approx_gelu).astype(compute_dtype)
    # Dropout(p=0.0) is identity -> omitted.
    # TODO(synk): training-mode dropout / grad checkpointing not implemented (inference fwd).
    acc_ref[...] += jnp.dot(h, w2_ref[...], preferred_element_type=jnp.float32)

    # --- finalize: bias, GELU, residual ---
    @pl.when(k == nk - 1)
    def _finalize():
        y = _gelu(acc_ref[...] + b2_ref[...], approx_gelu)
        o_ref[...] = (y + x_ref[...].astype(jnp.float32)).astype(o_ref.dtype)


def _footprint_bytes(tile_rows, tile_di, d_pad, cw, cio):
    """Conservative VMEM estimate (2 pipeline buffers for every input)."""
    wb = 2 * 2 * d_pad * tile_di * cw                 # w1 + w2 (double buffered)
    bb = 2 * tile_di * 4 + 2 * d_pad * 4              # biases (f32)
    io = 2 * tile_rows * d_pad * cio * 2              # x + out double buffers
    sc = tile_rows * d_pad * (cw + 4)                 # xn + f32 accumulator scratch
    tmp = tile_rows * tile_di * (4 + cw) + tile_rows * d_pad * 8   # h, y, x_in temps
    return wb + bb + io + sc + tmp


def mlp_forward(x, w1, b1, w2, b2, *, compute_dtype=jnp.bfloat16, approx_gelu=True,
                io_dtype=None, tile_rows=None, tile_di=None):
    """x: (batch, seq, dim_embed). Returns same shape, dtype = x.dtype.

    Defaults are the fast path: bf16 MXU operands + bf16 activation I/O + tanh GELU
    (f32 accumulation / LayerNorm / residual).  For bit-accuracy checking use
    compute_dtype=jnp.float32, approx_gelu=False, io_dtype=jnp.float32.
    """
    B, S, D = x.shape
    Din, Di = w1.shape
    Di2, Do = w2.shape
    assert Din == D and Di2 == Di and Do == D, \
        "residual path assumes dim_embed_out == dim_embed"

    compute_dtype = jnp.dtype(compute_dtype)
    if io_dtype is None:
        io_dtype = (jnp.dtype(jnp.bfloat16) if compute_dtype == jnp.dtype(jnp.bfloat16)
                    else jnp.dtype(x.dtype))
    else:
        io_dtype = jnp.dtype(io_dtype)

    M = B * S
    D_pad = _round_up(D, 128)              # lane-dense loads/stores
    cw, cio = compute_dtype.itemsize, io_dtype.itemsize

    cap = _vmem_capacity_bytes()
    usable = int(cap * 0.75)               # ~48 MiB on v7x, ~96 MiB on v5e/v6e

    # --- row tile: big tiles amortize per-step overhead; keep >= 4 grid blocks
    #     so both v7x TensorCores get >= 2 pipelined steps each. ---
    if tile_rows is None:
        tile_rows = 1024 if cap >= (100 << 20) else 512
        while tile_rows > 8 and pl.cdiv(M, tile_rows) < 4:
            tile_rows //= 2
    tile_rows = max(8, _round_up(int(tile_rows), 8))

    # --- hidden-dim chunk: fully resident if it fits the VMEM budget, otherwise
    #     stream Di in chunks over the reduction grid axis. ---
    Di_pad0 = _round_up(Di, 128)
    if tile_di is None:
        tile_di = Di_pad0
        while _footprint_bytes(tile_rows, tile_di, D_pad, cw, cio) > usable:
            if tile_di > 512:
                tile_di = _round_up(tile_di // 2, 128)
            elif tile_rows > 64:
                tile_rows //= 2
            elif tile_di > 128:
                tile_di = _round_up(tile_di // 2, 128)
            elif tile_rows > 8:
                tile_rows //= 2
            else:
                break
    tile_di = max(128, _round_up(int(tile_di), 128))
    Di_pad = _round_up(Di, tile_di)        # tile_di | Di_pad (zero-padded weights)

    grid_m = pl.cdiv(M, tile_rows)         # partial edge block handled by Pallas
    grid_k = Di_pad // tile_di

    # --- pad / cast operands (padded lanes & hidden channels are exact zeros) ---
    x2 = jnp.pad(x.reshape(M, D), ((0, 0), (0, D_pad - D))).astype(io_dtype)
    w1p = jnp.pad(w1, ((0, D_pad - D), (0, Di_pad - Di))).astype(compute_dtype)
    w2p = jnp.pad(w2, ((0, Di_pad - Di), (0, D_pad - D))).astype(compute_dtype)
    b1p = jnp.pad(b1, (0, Di_pad - Di)).reshape(1, Di_pad).astype(jnp.float32)
    b2p = jnp.pad(b2, (0, D_pad - D)).reshape(1, D_pad).astype(jnp.float32)

    fp = _footprint_bytes(tile_rows, tile_di, D_pad, cw, cio)
    vmem_limit = int(min(usable, max(fp + (8 << 20), 32 << 20)))

    sb = _single_buffer_supported()
    invariant_w = sb and (grid_k == 1)     # weights loop-invariant -> 1 resident copy
    invariant_b2 = sb                      # b2 is always loop-invariant

    def spec(shape, index_map, single_buffer=False):
        if single_buffer:
            return pl.BlockSpec(shape, index_map, pipeline_mode=pl.Buffered(1))
        return pl.BlockSpec(shape, index_map)

    in_specs = [
        spec((tile_rows, D_pad), lambda i, k: (i, 0)),
        spec((D_pad, tile_di), lambda i, k: (0, k), invariant_w),
        spec((1, tile_di), lambda i, k: (0, k), invariant_w),
        spec((tile_di, D_pad), lambda i, k: (k, 0), invariant_w),
        spec((1, D_pad), lambda i, k: (0, 0), invariant_b2),
    ]

    w_reads = grid_m if grid_k > 1 else 1
    cost = pl.CostEstimate(
        flops=int(4 * M * D_pad * Di_pad),
        transcendentals=int(M * (Di_pad + D_pad)),
        bytes_accessed=int(2 * M * D_pad * cio + w_reads * 2 * D_pad * Di_pad * cw),
    )

    kernel = functools.partial(mlp_kernel, d_real=D, approx_gelu=approx_gelu,
                               compute_dtype=compute_dtype)

    out = pl.pallas_call(
        kernel,
        out_shape=jax.ShapeDtypeStruct((M, D_pad), io_dtype),
        grid_spec=pltpu.PrefetchScalarGridSpec(
            num_scalar_prefetch=0,
            grid=(grid_m, grid_k),
            in_specs=in_specs,
            out_specs=pl.BlockSpec((tile_rows, D_pad), lambda i, k: (i, 0)),
            scratch_shapes=[
                pltpu.VMEM((tile_rows, D_pad), compute_dtype),   # normalized x
                pltpu.VMEM((tile_rows, D_pad), jnp.float32),     # layer-2 accumulator
            ],
        ),
        compiler_params=pltpu.CompilerParams(
            dimension_semantics=("parallel", "arbitrary"),
            vmem_limit_bytes=vmem_limit,
        ),
        cost_estimate=cost,
    )(x2, w1p, b1p, w2p, b2p)

    return out[:, :D].astype(x.dtype).reshape(B, S, D)


def _ref_forward(x, w1, b1, w2, b2):
    """Pure-JAX reference for the same forward pass (f32, exact GELU)."""
    x32 = x.astype(jnp.float32)
    mu = jnp.mean(x32, axis=-1, keepdims=True)
    var = jnp.mean((x32 - mu) ** 2, axis=-1, keepdims=True)
    xn = (x32 - mu) * jax.lax.rsqrt(var + LN_EPS)
    h = _gelu(xn @ w1 + b1, False)
    y = _gelu(h @ w2 + b2, False)
    return (y + x32).astype(x.dtype)


if __name__ == "__main__":
    key = jax.random.PRNGKey(0)
    keys = jax.random.split(key, 10)

    # ---- Test 1 & 2: module-default shapes (batch=2, seq=8, dim_embed=32) ----
    B, S, D = 2, 8, 32
    Di = 2 * D                                 # dim_internal_factor = 2
    x = jax.random.normal(keys[0], (B, S, D), dtype=jnp.float32)
    bound1 = 1.0 / (D ** 0.5)
    w1 = jax.random.uniform(keys[1], (D, Di), jnp.float32, -bound1, bound1)
    b1 = jax.random.uniform(keys[2], (Di,), jnp.float32, -bound1, bound1)
    bound2 = 1.0 / (Di ** 0.5)
    w2 = jax.random.uniform(keys[3], (Di, D), jnp.float32, -bound2, bound2)
    b2 = jax.random.uniform(keys[4], (D,), jnp.float32, -bound2, bound2)
    ref = _ref_forward(x, w1, b1, w2, b2)

    # Bit-accuracy path: f32 MXU operands, exact erf GELU, f32 I/O.
    out_exact = jax.block_until_ready(
        mlp_forward(x, w1, b1, w2, b2, compute_dtype=jnp.float32,
                    approx_gelu=False, io_dtype=jnp.float32))
    assert out_exact.shape == (B, S, D)
    assert jnp.allclose(out_exact, ref, atol=1e-4, rtol=1e-4), \
        "f32 kernel mismatch vs JAX reference"

    # Default fast path: bf16 MXU + bf16 activation I/O + tanh GELU.
    out_fast = jax.block_until_ready(mlp_forward(x, w1, b1, w2, b2))
    assert out_fast.shape == (B, S, D) and out_fast.dtype == x.dtype
    assert jnp.allclose(out_fast, ref, atol=6e-2, rtol=6e-2), \
        "bf16 fast-path mismatch vs JAX reference"

    # ---- Test 3: hidden-dim streaming path (grid over Di chunks + accumulator) ----
    D2, Di2 = 256, 512
    x3 = jax.random.normal(keys[5], (B, S, D2), dtype=jnp.float32)
    b1_ = 1.0 / (D2 ** 0.5)
    b2_ = 1.0 / (Di2 ** 0.5)
    w3 = jax.random.uniform(keys[6], (D2, Di2), jnp.float32, -b1_, b1_)
    b3 = jax.random.uniform(keys[7], (Di2,), jnp.float32, -b1_, b1_)
    w4 = jax.random.uniform(keys[8], (Di2, D2), jnp.float32, -b2_, b2_)
    b4 = jax.random.uniform(keys[9], (D2,), jnp.float32, -b2_, b2_)
    ref3 = _ref_forward(x3, w3, b3, w4, b4)
    out_stream = jax.block_until_ready(
        mlp_forward(x3, w3, b3, w4, b4, compute_dtype=jnp.float32,
                    approx_gelu=False, io_dtype=jnp.float32, tile_di=128))
    assert out_stream.shape == (B, S, D2)
    assert jnp.allclose(out_stream, ref3, atol=2e-3, rtol=2e-3), \
        "Di-streaming kernel mismatch vs JAX reference"

    print("KERNEL_OK")
</pallas_src>

<mosaic_0001>
module attributes {stable_mosaic.version = 11 : i64} {
  func.func @_probe_kernel(%arg0: i32, %arg1: memref<8x128xf32, #tpu.memory_space<vmem>>, %arg2: memref<8x128xf32, #tpu.memory_space<vmem>>) attributes {dimension_semantics = [#tpu.dimension_semantics<arbitrary>], iteration_bounds = array<i64: 1>, scalar_prefetch = 0 : i64, scratch_operands = 0 : i64, tpu.core_type = #tpu.core_type<tc>, window_params = [{pipeline_mode = #tpu.pipeline_mode<synchronous>, transform_indices = @transform_0, window_bounds = array<i64: 8, 128>}, {pipeline_mode = #tpu.pipeline_mode<synchronous>, transform_indices = @transform_1, window_bounds = array<i64: 8, 128>}]} {
    %c0 = arith.constant 0 : index
    %c0_0 = arith.constant 0 : index
    %0 = vector.load %arg1[%c0, %c0_0] : memref<8x128xf32, #tpu.memory_space<vmem>>, vector<8x128xf32>
    %c0_1 = arith.constant 0 : index
    %c0_2 = arith.constant 0 : index
    %1 = vector.load %arg2[%c0_1, %c0_2] : memref<8x128xf32, #tpu.memory_space<vmem>>, vector<8x128xf32>
    tpu.vector_store %arg2[%c0_1, %c0_2], %0 {strides = array<i32>} : memref<8x128xf32, #tpu.memory_space<vmem>>, vector<8x128xf32>,
    return
  }
  func.func @transform_0(%arg0: i32) -> (i32, i32) {
    %c0_i32 = arith.constant 0 : i32
    %c0_i32_0 = arith.constant 0 : i32
    %c0_i32_1 = arith.constant 0 : i32
    return %c0_i32, %c0_i32_0 : i32, i32
  }
  func.func @transform_1(%arg0: i32) -> (i32, i32) {
    %c0_i32 = arith.constant 0 : i32
    %c0_i32_0 = arith.constant 0 : i32
    %c0_i32_1 = arith.constant 0 : i32
    return %c0_i32, %c0_i32_0 : i32, i32
  }
}

module attributes {stable_mosaic.version = 11 : i64} {
  func.func @mlp_kernel(%arg0: i32, %arg1: i32, %arg2: memref<8x128xf32, #tpu.memory_space<vmem>>, %arg3: memref<128x128xf32, #tpu.memory_space<vmem>>, %arg4: memref<1x128xf32, #tpu.memory_space<vmem>>, %arg5: memref<128x128xf32, #tpu.memory_space<vmem>>, %arg6: memref<1x128xf32, #tpu.memory_space<vmem>>, %arg7: memref<8x128xf32, #tpu.memory_space<vmem>>, %arg8: memref<8x128xf32, #tpu.memory_space<vmem>>, %arg9: memref<8x128xf32, #tpu.memory_space<vmem>>) attributes {dimension_semantics = [#tpu.dimension_semantics<parallel>, #tpu.dimension_semantics<arbitrary>], iteration_bounds = array<i64: 2, 1>, scalar_prefetch = 0 : i64, scratch_operands = 2 : i64, tpu.core_type = #tpu.core_type<tc>, window_params = [{transform_indices = @transform_0, window_bounds = array<i64: 8, 128>}, {transform_indices = @transform_1, window_bounds = array<i64: 128, 128>}, {transform_indices = @transform_2, window_bounds = array<i64: 1, 128>}, {transform_indices = @transform_3, window_bounds = array<i64: 128, 128>}, {pipeline_mode = #tpu.pipeline_mode<synchronous>, transform_indices = @transform_4, window_bounds = array<i64: 1, 128>}, {transform_indices = @transform_5, window_bounds = array<i64: 8, 128>}]} {
    %c0_i32 = arith.constant 0 : i32
    %0 = arith.cmpi eq, %arg1, %c0_i32 : i32
    %1 = arith.extui %0 : i1 to i32
    %c0_i32_0 = arith.constant 0 : i32
    %2 = arith.cmpi ne, %1, %c0_i32_0 : i32
    scf.if %2 {
      %c0_18 = arith.constant 0 : index
      %c0_19 = arith.constant 0 : index
      %25 = vector.load %arg2[%c0_18, %c0_19] : memref<8x128xf32, #tpu.memory_space<vmem>>, vector<8x128xf32>
      %cst_20 = arith.constant dense<0.000000e+00> : vector<8xf32>
      %26 = vector.multi_reduction <add>, %25, %cst_20 [1] : vector<8x128xf32> to vector<8xf32>
      %27 = vector.shape_cast %26 : vector<8xf32> to vector<8x1xf32>
      %28 = arith.mulf %25, %25 : vector<8x128xf32>
      %cst_21 = arith.constant dense<0.000000e+00> : vector<8xf32>
      %29 = vector.multi_reduction <add>, %28, %cst_21 [1] : vector<8x128xf32> to vector<8xf32>
      %30 = vector.shape_cast %29 : vector<8xf32> to vector<8x1xf32>
      %cst_22 = arith.constant 3.125000e-02 : f32
      %31 = vector.broadcast %cst_22 : f32 to vector<8x1xf32>
      %32 = arith.mulf %27, %31 : vector<8x1xf32>
      %cst_23 = arith.constant 3.125000e-02 : f32
      %33 = vector.broadcast %cst_23 : f32 to vector<8x1xf32>
      %34 = arith.mulf %30, %33 : vector<8x1xf32>
      %35 = arith.mulf %32, %32 : vector<8x1xf32>
      %36 = arith.subf %34, %35 : vector<8x1xf32>
      %cst_24 = arith.constant 0.000000e+00 : f32
      %37 = vector.broadcast %cst_24 : f32 to vector<8x1xf32>
      %38 = arith.maximumf %36, %37 : vector<8x1xf32>
      %39 = vector.broadcast %32 : vector<8x1xf32> to vector<8x128xf32>
      %40 = arith.subf %25, %39 : vector<8x128xf32>
      %cst_25 = arith.constant 9.99999974E-6 : f32
      %41 = vector.broadcast %cst_25 : f32 to vector<8x1xf32>
      %42 = arith.addf %38, %41 : vector<8x1xf32>
      %43 = math.rsqrt %42 : vector<8x1xf32>
      %44 = vector.broadcast %43 : vector<8x1xf32> to vector<8x128xf32>
      %45 = arith.mulf %40, %44 : vector<8x128xf32>
      %c0_26 = arith.constant 0 : index
      %c0_27 = arith.constant 0 : index
      %46 = vector.load %arg8[%c0_26, %c0_27] : memref<8x128xf32, #tpu.memory_space<vmem>>, vector<8x128xf32>
      tpu.vector_store %arg8[%c0_26, %c0_27], %45 {strides = array<i32>} : memref<8x128xf32, #tpu.memory_space<vmem>>, vector<8x128xf32>,
      %cst_28 = arith.constant 0.000000e+00 : f32
      %47 = vector.broadcast %cst_28 : f32 to vector<8x128xf32>
      %c0_29 = arith.constant 0 : index
      %c0_30 = arith.constant 0 : index
      %48 = vector.load %arg9[%c0_29, %c0_30] : memref<8x128xf32, #tpu.memory_space<vmem>>, vector<8x128xf32>
      tpu.vector_store %arg9[%c0_29, %c0_30], %47 {strides = array<i32>} : memref<8x128xf32, #tpu.memory_space<vmem>>, vector<8x128xf32>,
    } else {
    }
    %c0 = arith.constant 0 : index
    %c0_1 = arith.constant 0 : index
    %3 = vector.load %arg8[%c0, %c0_1] : memref<8x128xf32, #tpu.memory_space<vmem>>, vector<8x128xf32>
    %c0_2 = arith.constant 0 : index
    %c0_3 = arith.constant 0 : index
    %4 = vector.load %arg3[%c0_2, %c0_3] : memref<128x128xf32, #tpu.memory_space<vmem>>, vector<128x128xf32>
    %cst = arith.constant dense<0.000000e+00> : vector<8x128xf32>
    %5 = tpu.matmul %3, %4, %cst {dimension_numbers = #tpu.dot_dimension_numbers<[1], [0], [0], [1], [0, 0, 1, 1], [], []>} : vector<8x128xf32>, vector<128x128xf32>, vector<8x128xf32> -> vector<8x128xf32>
    %c0_4 = arith.constant 0 : index
    %c0_5 = arith.constant 0 : index
    %6 = vector.load %arg4[%c0_4, %c0_5] : memref<1x128xf32, #tpu.memory_space<vmem>>, vector<1x128xf32>
    %7 = vector.broadcast %6 : vector<1x128xf32> to vector<8x128xf32>
    %8 = arith.addf %5, %7 : vector<8x128xf32>
    %cst_6 = arith.constant 5.000000e-01 : f32
    %9 = vector.broadcast %cst_6 : f32 to vector<8x128xf32>
    %10 = arith.mulf %9, %8 : vector<8x128xf32>
    %cst_7 = arith.constant 0.707106769 : f32
    %11 = vector.broadcast %cst_7 : f32 to vector<8x128xf32>
    %12 = arith.mulf %8, %11 : vector<8x128xf32>
    %13 = math.erf %12 : vector<8x128xf32>
    %cst_8 = arith.constant 1.000000e+00 : f32
    %14 = vector.broadcast %cst_8 : f32 to vector<8x128xf32>
    %15 = arith.addf %14, %13 : vector<8x128xf32>
    %16 = arith.mulf %10, %15 : vector<8x128xf32>
    %c0_9 = arith.constant 0 : index
    %c0_10 = arith.constant 0 : index
    %17 = vector.load %arg9[%c0_9, %c0_10] : memref<8x128xf32, #tpu.memory_space<vmem>>, vector<8x128xf32>
    %c0_11 = arith.constant 0 : index
    %c0_12 = arith.constant 0 : index
    %18 = vector.load %arg5[%c0_11, %c0_12] : memref<128x128xf32, #tpu.memory_space<vmem>>, vector<128x128xf32>
    %cst_13 = arith.constant dense<0.000000e+00> : vector<8x128xf32>
    %19 = tpu.matmul %16, %18, %cst_13 {dimension_numbers = #tpu.dot_dimension_numbers<[1], [0], [0], [1], [0, 0, 1, 1], [], []>} : vector<8x128xf32>, vector<128x128xf32>, vector<8x128xf32> -> vector<8x128xf32>
    %20 = arith.addf %17, %19 : vector<8x128xf32>
    %c0_14 = arith.constant 0 : index
    %c0_15 = arith.constant 0 : index
    %21 = vector.load %arg9[%c0_14, %c0_15] : memref<8x128xf32, #tpu.memory_space<vmem>>, vector<8x128xf32>
    tpu.vector_store %arg9[%c0_14, %c0_15], %20 {strides = array<i32>} : memref<8x128xf32, #tpu.memory_space<vmem>>, vector<8x128xf32>,
    %c0_i32_16 = arith.constant 0 : i32
    %22 = arith.cmpi eq, %arg1, %c0_i32_16 : i32
    %23 = arith.extui %22 : i1 to i32
    %c0_i32_17 = arith.constant 0 : i32
    %24 = arith.cmpi ne, %23, %c0_i32_17 : i32
    scf.if %24 {
      %c0_18 = arith.constant 0 : index
      %c0_19 = arith.constant 0 : index
      %25 = vector.load %arg9[%c0_18, %c0_19] : memref<8x128xf32, #tpu.memory_space<vmem>>, vector<8x128xf32>
      %c0_20 = arith.constant 0 : index
      %c0_21 = arith.constant 0 : index
      %26 = vector.load %arg6[%c0_20, %c0_21] : memref<1x128xf32, #tpu.memory_space<vmem>>, vector<1x128xf32>
      %27 = vector.broadcast %26 : vector<1x128xf32> to vector<8x128xf32>
      %28 = arith.addf %25, %27 : vector<8x128xf32>
      %cst_22 = arith.constant 5.000000e-01 : f32
      %29 = vector.broadcast %cst_22 : f32 to vector<8x128xf32>
      %30 = arith.mulf %29, %28 : vector<8x128xf32>
      %cst_23 = arith.constant 0.707106769 : f32
      %31 = vector.broadcast %cst_23 : f32 to vector<8x128xf32>
      %32 = arith.mulf %28, %31 : vector<8x128xf32>
      %33 = math.erf %32 : vector<8x128xf32>
      %cst_24 = arith.constant 1.000000e+00 : f32
      %34 = vector.broadcast %cst_24 : f32 to vector<8x128xf32>
      %35 = arith.addf %34, %33 : vector<8x128xf32>
      %36 = arith.mulf %30, %35 : vector<8x128xf32>
      %c0_25 = arith.constant 0 : index
      %c0_26 = arith.constant 0 : index
      %37 = vector.load %arg2[%c0_25, %c0_26] : memref<8x128xf32, #tpu.memory_space<vmem>>, vector<8x128xf32>
      %38 = arith.addf %36, %37 : vector<8x128xf32>
      %c0_27 = arith.constant 0 : index
      %c0_28 = arith.constant 0 : index
      %39 = vector.load %arg7[%c0_27, %c0_28] : memref<8x128xf32, #tpu.memory_space<vmem>>, vector<8x128xf32>
      tpu.vector_store %arg7[%c0_27, %c0_28], %38 {strides = array<i32>} : memref<8x128xf32, #tpu.memory_space<vmem>>, vector<8x128xf32>,
    } else {
    }
    return
  }
  func.func @transform_0(%arg0: i32, %arg1: i32) -> (i32, i32) {
    %c0_i32 = arith.constant 0 : i32
    %c0_i32_0 = arith.constant 0 : i32
    return %arg0, %c0_i32 : i32, i32
  }
  func.func @transform_1(%arg0: i32, %arg1: i32) -> (i32, i32) {
    %c0_i32 = arith.constant 0 : i32
    %c0_i32_0 = arith.constant 0 : i32
    return %c0_i32, %arg1 : i32, i32
  }
  func.func @transform_2(%arg0: i32, %arg1: i32) -> (i32, i32) {
    %c0_i32 = arith.constant 0 : i32
    %c0_i32_0 = arith.constant 0 : i32
    return %c0_i32, %arg1 : i32, i32
  }
  func.func @transform_3(%arg0: i32, %arg1: i32) -> (i32, i32) {
    %c0_i32 = arith.constant 0 : i32
    %c0_i32_0 = arith.constant 0 : i32
    return %arg1, %c0_i32 : i32, i32
  }
  func.func @transform_4(%arg0: i32, %arg1: i32) -> (i32, i32) {
    %c0_i32 = arith.constant 0 : i32
    %c0_i32_0 = arith.constant 0 : i32
    %c0_i32_1 = arith.constant 0 : i32
    return %c0_i32, %c0_i32_0 : i32, i32
  }
  func.func @transform_5(%arg0: i32, %arg1: i32) -> (i32, i32) {
    %c0_i32 = arith.constant 0 : i32
    %c0_i32_0 = arith.constant 0 : i32
    return %arg0, %c0_i32 : i32, i32
  }
}

</mosaic_0001>

<bundles_post_ra>
// kernel: tpu_custom_call.1
= control target key start
LH: loop header
LB: loop body
LE: loop exit
PB: predicated region body
PF: predicated region fallthrough
CT: control target
= control target key end

     0   :  { %6 = vsyncpa [#allocation3], 0  ;;  %s124_s0 = inlined_call_operand.hbm [shape: f32[8,128], index: 0, kind: input, shape index: {}]   ;;  %s125_s1 = inlined_call_operand.hbm [shape: f32[8,128], index: 1, kind: output, shape index: {}]  }
   0x1   :  { %7 = vsyncpa [#allocation4], 0  ;;  %s88_s6 = smov [#allocation2]   ;;  %s40_s10 = scalar_lea.hbm %s124_s0, 128 }
   0x2   :  { %s14_s7 = sshll.u32 %s88_s6, 4  ;;  %p41_p0 = scmp.ne.s32.totalorder %s124_s0, %s40_s10  ;;  %s15_s7 = int_to_ptr.vmem [resolvable:$true] %s14_s7 }
   0x3   :  { %p44_p1 = scmp.lt.u32.totalorder %s40_s10, %s124_s0 }
   0x5   :  { %p46_p2 = pnand %p44_p1, %p41_p0 }
   0x7   :  { %49 = shalt.err (!%p46_p2)
}
   0x8   :  { %s50_s15 = scalar_lea.vmem %s15_s7, 128  ;;  %p55_p4 = scmp.lt.s32.totalorder %s15_s7, %s15_s7 }
   0x9   :  { %p51_p3 = scmp.ne.s32.totalorder %s15_s7, %s50_s15  ;;  %p56_p5 = scmp.lt.s32.totalorder %s50_s15, %s50_s15 }
   0xb   :  { %p57_p6 = por %p56_p5, %p55_p4 }
   0xd   :  { %p58_p7 = pnand %p57_p6, %p51_p3 }
   0xf   :  { %61 = shalt.err (!%p58_p7)
}
  0x10   :  { %17 = dma.hbm_to_vmem [thread:$0]  %s124_s0, 128, %s15_s7, [#allocation3]  }
  0x11   :  { %84 = dma.done.wait [#allocation3], 128  }
  0x12   :  { %85 = vsyncadd [#allocation3], 4294967168  ;;  %s89_s18 = smov [#allocation5]   ;;  %v21_v0 = vld [vmem:[#allocation2] sm:$0xff] }
  0x13   :  { %s29_s19 = sshll.u32 %s89_s18, 4  ;;  %22 = vst [vmem:[#allocation5] sm:$0xff] %v21_v0  ;;  %s30_s19 = int_to_ptr.vmem [resolvable:$true] %s29_s19 }
  0x14   :  { %s62_s20 = scalar_lea.vmem %s30_s19, 128  ;;  %p67_p9 = scmp.lt.s32.totalorder %s30_s19, %s30_s19 }
  0x15   :  { %p63_p8 = scmp.ne.s32.totalorder %s30_s19, %s62_s20  ;;  %p68_p10 = scmp.lt.s32.totalorder %s62_s20, %s62_s20 }
  0x17   :  { %p69_p11 = por %p68_p10, %p67_p9 }
  0x19   :  { %p70_p12 = pnand %p69_p11, %p63_p8 }
  0x1b   :  { %73 = shalt.err (!%p70_p12)
}
  0x1c   :  { %s74_s23 = scalar_lea.hbm %s125_s1, 128 }
  0x1d   :  { %p75_p13 = scmp.ne.s32.totalorder %s125_s1, %s74_s23  ;;  %p78_p0 = scmp.lt.u32.totalorder %s74_s23, %s125_s1 }
  0x1f   :  { %p80_p1 = pnand %p78_p0, %p75_p13 }
  0x21   :  { %83 = shalt.err (!%p80_p1)
}
  0x22   :  { %32 = dma.vmem_to_hbm [thread:$0]  %s30_s19, 128, %s125_s1, [#allocation4]  }
  0x23   :  { %86 = dma.done.wait [#allocation4], 128  }
  0x24   :  { %87 = vsyncadd [#allocation4], 4294967168 }
  0x25   :  { %36 = vsyncpa [#allocation3], 1 }
  0x26   :  { %37 = vsyncpa [#allocation4], 1 }

// kernel: tpu_custom_call.1
= control target key start
LH: loop header
LB: loop body
LE: loop exit
PB: predicated region body
PF: predicated region fallthrough
CT: control target
= control target key end

     0   :  { %10 = vsyncpa [#allocation5], 0  ;;  %s1429_s0 = inlined_call_operand.hbm [shape: f32[16,128], index: 0, kind: input, shape index: {}]   ;;  %s1430_s1 = inlined_call_operand.hbm [shape: f32[128,128], index: 1, kind: input, shape index: {}]   ;;  %s1431_s2 = inlined_call_operand.vmem [shape: f32[1,128], index: 2, kind: input, shape index: {}]   ;;  %s1432_s3 = inlined_call_operand.hbm [shape: f32[128,128], index: 3, kind: input, shape index: {}]   ;;  %s1433_s4 = inlined_call_operand.vmem [shape: f32[1,128], index: 4, kind: input, shape index: {}]   ;;  %s1434_s5 = inlined_call_operand.hbm [shape: f32[16,128], index: 5, kind: output, shape index: {}]  }
   0x1   :  { %12 = vsyncpa [#allocation5 + $0x1], 0 }
   0x2   :  { %13 = vsyncpa [#allocation8], 0 }
   0x3   :  { %14 = vsyncpa [#allocation6], 0 }
   0x4   :  { %16 = vsyncpa [#allocation6 + $0x1], 0  ;;  %s1146_s18 = smov 0   ;;  %s1148_s19 = smov 0  }
   0x5   :  { %s1150_s20 = smov 0   ;;  %s1152_s21 = smov 0  }
   0x6   :  { %s1154_s22 = smov 0   ;;  %s1156_s23 = smov 0  }
   0x7 LB: > { %s667_s24 = sadd.s32 4294967295, %s1105_s23   ;;  %s668_s25 = sadd.s32 4294967294, %s1105_s23   ;;  %s1105_s23 = sphi %s1156_s23, %s22_s23   ;;  %s1101_s22 = sphi %s1154_s22, %s1456_s22   ;;  %s1097_s21 = sphi %s1152_s21, %s1455_s21   ;;  %s1093_s20 = sphi %s1150_s20, %s1454_s20   ;;  %s1089_s19 = sphi %s1148_s19, %s1453_s19   ;;  %s1085_s18 = sphi %s1146_s18, %s1452_s18  }
   0x8   : > { %p54_p0 = scmp.ne.s32.totalorder %s1089_s19, %s1085_s18  ;;  %p1180_p1 = scmp.eq.s32.totalorder %s667_s24, 0 }
   0x9   : > { %p1184_p2 = scmp.eq.s32.totalorder %s667_s24, 1  ;;  %p183_p3 = scmp.eq.s32.totalorder %s668_s25, 1 }
   0xa   : > { %s1439_s26 = scalar_select %p1180_p1, 1, 0 }
   0xb   : > { %p1190_p4 = por %p1180_p1, %p54_p0  ;;  %p669_p5 = scmp.ge.s32.totalorder %s1105_s23, 1 }
   0xc   : > { %p1195_p6 = por %p183_p3, %p54_p0  ;;  %p190_p7 = scmp.lt.s32.totalorder %s1105_s23, 3 }
   0xd   : > { %s1441_s28 = scalar_select %p1190_p4, 1, 0 }
   0xe   : > { %s1442_s29 = scalar_select %p1195_p6, 1, 0 }
   0xf   : > { %p1200_p8 = pnand %p669_p5, %p190_p7  ;;  %s1107_s6 = smov [#allocation7]  }
  0x10   : > { %s204_s7 = sshll.u32 %s1107_s6, 4  ;;  %s1108_s9 = smov [#allocation9]   ;;  %s1204_s7 = int_to_ptr.vmem [resolvable:$true] %s204_s7 }
  0x11   : > { %p851_p9 = pneg %p1200_p8  ;;  %s226_s10 = sshll.u32 %s1108_s9, 4  ;;  %s1215_s10 = int_to_ptr.vmem [resolvable:$true] %s226_s10 }
  0x12   : > { %s933_s13 = scalar_lea.hbm %s1430_s1, 2048 }
  0x13   : > { %p1211_p11 = pnand %p851_p9, %p1180_p1  ;;  %p934_p12 = scmp.ne.s32.totalorder %s1430_s1, %s933_s13 }
  0x14   : > { %p940_p5 = scmp.lt.u32.totalorder %s933_s13, %s1430_s1 }
  0x15   : > { %p935_p13 = pneg %p1211_p11 }
  0x17   : > { %p936_p0 = pnand %p935_p13, %p934_p12 }
  0x19   : > { %p937_p3 = pneg %p936_p0 }
  0x1b   : > { %p942_p7 = pnand %p940_p5, %p937_p3 }
  0x1d   : > { %945 = shalt.err (!%p942_p7)
}
  0x1e   : > { %s946_s24 = scalar_lea.vmem %s1204_s7, 2048  ;;  %p954_p1 = scmp.lt.s32.totalorder %s1204_s7, %s1204_s7 }
  0x1f   : > { %p947_p9 = scmp.ne.s32.totalorder %s1204_s7, %s946_s24  ;;  %p955_p12 = scmp.lt.s32.totalorder %s946_s24, %s946_s24 }
  0x21   : > { %p949_p10 = pnand %p947_p9, %p935_p13  ;;  %p956_p0 = por %p955_p12, %p954_p1 }
  0x23   : > { %p950_p6 = pneg %p949_p10 }
  0x25   : > { %p957_p4 = pnand %p956_p0, %p950_p6 }
  0x27   : > { %960 = shalt.err (!%p957_p4)
}
  0x28   : > { %s1109_s25 = smov 128   ;;  %s1110_s6 = smov 8  }
  0x29   : > { %854 = dma.hbm_to_vmem [thread:$0]  (!%p1211_p11), %s1430_s1, 2048, %s1204_s7, [#allocation8], %s1109_s25, %s1109_s25, %s1110_s6  }
  0x2a   : > { %s961_s14 = scalar_lea.hbm %s1432_s3, 2048 }
  0x2b   : > { %p962_p1 = scmp.ne.s32.totalorder %s1432_s3, %s961_s14  ;;  %p968_p10 = scmp.lt.u32.totalorder %s961_s14, %s1432_s3 }
  0x2d   : > { %p964_p4 = pnand %p962_p1, %p935_p13 }
  0x2f   : > { %p965_p6 = pneg %p964_p4 }
  0x31   : > { %p970_p3 = pnand %p968_p10, %p965_p6 }
  0x33   : > { %973 = shalt.err (!%p970_p3)
}
  0x34   : > { %s974_s7 = scalar_lea.vmem %s1215_s10, 2048  ;;  %p982_p12 = scmp.lt.s32.totalorder %s1215_s10, %s1215_s10 }
  0x35   : > { %p975_p5 = scmp.ne.s32.totalorder %s1215_s10, %s974_s7  ;;  %p983_p0 = scmp.lt.s32.totalorder %s974_s7, %s974_s7 }
  0x37   : > { %p977_p7 = pnand %p975_p5, %p935_p13  ;;  %p984_p1 = por %p983_p0, %p982_p12 }
  0x39   : > { %p978_p9 = pneg %p977_p7 }
  0x3b   : > { %p985_p4 = pnand %p984_p1, %p978_p9 }
  0x3d   : > { %988 = shalt.err (!%p985_p4)
}
  0x3e   : > { %857 = dma.hbm_to_vmem [thread:$0]  (!%p1211_p11), %s1432_s3, 2048, %s1215_s10, [#allocation8], %s1109_s25, %s1109_s25, %s1110_s6  }
  0x3f   : > { %s34_s12 = sadd.s32 1, %s1101_s22  ;;  %s41_s13 = sadd.s32 1, %s1093_s20 }
  0x40   : > { %p36_p13 = scmp.ge.s32.totalorder %s34_s12, 2  ;;  %p48_p6 = scmp.ne.s32.totalorder %s1093_s20, %s1089_s19 }
  0x41   : > { %p49_p10 = scmp.eq.s32.totalorder %s1105_s23, 0  ;;  %p868_p3 = scmp.lt.s32.totalorder %s1105_s23, 2 }
  0x42   : > { %s1458_s12 = smov (%p36_p13, %s34_s12), 0  ;;  %p1279_p7 = por %p1184_p2, %p48_p6 }
  0x43   : > { %p50_p5 = por %p49_p10, %p48_p6  ;;  %s38_s14 = ssub.s32 %s1101_s22, %s1458_s12 }
  0x44   : > { %s1445_s8 = scalar_select %p1279_p7, 1, 0 }
  0x45   : > { %s243_s15 = sand.u32 1, %s1093_s20   ;;  %p39_p9 = scmp.eq.s32.totalorder %s38_s14, 0 }
  0x46   : > { %s674_s10 = sshll.u32 %s243_s15, 3  ;;  %s675_s25 = sshll.u32 %s1101_s22, 7 }
  0x47   : > { %s1288_s6 = scalar_select %p39_p9, %s1093_s20, %s41_s13  }
  0x48   : > { %s1293_s24 = scalar_lea.hbm %s1429_s0, %s675_s25  ;;  %s247_s27 = scalar_lea.vmem [#allocation4], %s674_s10 }
  0x49   : > { %s254_s7 = sshll.u32 %s247_s27, 4  ;;  %p1297_p2 = pnand %p868_p3, %p50_p5  ;;  %s1301_s7 = int_to_ptr.vmem [resolvable:$true] %s254_s7 }
  0x4a   : > { %s244_s11 = scalar_lea.sflag [#allocation5], %s243_s15  ;;  %s989_s13 = scalar_lea.hbm %s1293_s24, 128 }
  0x4b   : > { %p990_p11 = scmp.ne.s32.totalorder %s1293_s24, %s989_s13  ;;  %p991_p12 = pneg %p1297_p2 }
  0x4c   : > { %s994_s25 = scalar_lea.hbm %s1429_s0, 256  ;;  %p995_p4 = scmp.lt.u32.totalorder %s1293_s24, %s1429_s0 }
  0x4d   : > { %p992_p0 = pnand %p991_p12, %p990_p11  ;;  %p996_p13 = scmp.lt.u32.totalorder %s994_s25, %s989_s13 }
  0x4e   : > { %p998_p10 = scmp.lt.u32.totalorder %s989_s13, %s1293_s24 }
  0x4f   : > { %p993_p1 = pneg %p992_p0  ;;  %p997_p6 = por %p996_p13, %p995_p4 }
  0x51   : > { %p999_p3 = por %p998_p10, %p997_p6 }
  0x53   : > { %p1000_p5 = pnand %p999_p3, %p993_p1 }
  0x55   : > { %1003 = shalt.err (!%p1000_p5)
}
  0x56   : > { %s1004_s15 = scalar_lea.vmem %s1301_s7, 128  ;;  %s1111_s27 = smov [#allocation4]  }
  0x57   : > { %p1005_p9 = scmp.ne.s32.totalorder %s1301_s7, %s1004_s15  ;;  %s1009_s14 = sshll.u32 %s1111_s27, 4  ;;  %s1010_s14 = int_to_ptr.vmem [resolvable:$false] %s1009_s14 }
  0x58   : > { %s1011_s10 = scalar_lea.vmem %s1010_s14, 256  ;;  %p1012_p7 = scmp.lt.s32.totalorder %s1301_s7, %s1010_s14 }
  0x59   : > { %p1007_p11 = pnand %p1005_p9, %p991_p12  ;;  %p1013_p4 = scmp.lt.s32.totalorder %s1011_s10, %s1004_s15 }
  0x5b   : > { %p1008_p0 = pneg %p1007_p11  ;;  %p1014_p13 = por %p1013_p4, %p1012_p7 }
  0x5d   : > { %p1015_p6 = pnand %p1014_p13, %p1008_p0 }
  0x5f   : > { %1018 = shalt.err (!%p1015_p6)
}
  0x60   : > { %861 = dma.hbm_to_vmem [thread:$0]  (!%p1297_p2), %s1293_s24, 128, %s1301_s7, %s244_s11  }
  0x61   : > { %263 = sbr.rel (%p1200_p8) target bundleno = 755 (0x2f3), region = 40  ;;  %s1331_s13 = sand.u32 (!%p1200_p8), 1, %s1089_s19  }
  0x62   : > { %s677_s25 = sshll.u32 (!%p1200_p8), %s1331_s13, 3  ;;  %s266_s16 = scalar_lea.sflag (!%p1200_p8), [#allocation5], %s1331_s13 }
  0x63   : > { %s269_s17 = scalar_lea.vmem (!%p1200_p8), [#allocation4], %s677_s25  ;;  %p1447_p7 = scmp.ne.s32.totalorder (!%p1200_p8), %s1441_s28, 0 }
  0x68   : > { %1072 = dma.done.wait (%p1447_p7), %s266_s16, 128  }
  0x69   : > { %1074 = vsyncadd (%p1447_p7), %s266_s16, 4294967168  ;;  %p1448_p2 = scmp.ne.s32.totalorder %s1439_s26, 0 }
  0x6b   : > { %1076 = dma.done.wait (%p1448_p2), [#allocation8], 4096  }
  0x6c   : > { %1078 = vsyncadd (%p1448_p2), [#allocation8], 4294963200  ;;  %v1112_v0 = vmov 0.0|0.0   ;;  %v1347_v1 = vld [vmem:[%s269_s17] sm:$0xff]  ;;  %v333_v2 = vld [vmem:[#allocation7] sm:$0xff]  ;;  %vm1113_vm0 = vmmov 0  }
  0x6d   : > { %791 = vmatprep.subr.bf16.mxu0 %v1112_v0  ;;  %815 = vmatprep.subr.bf16.mxu1 %v1112_v0  ;;  %v334_v3 = vld [vmem:[#allocation7 + $0x8] sm:$0xff]  ;;  %v318_v4 = vmul.f32 %v1347_v1, %v1347_v1  ;;  %v335_v6 = vld [vmem:[#allocation7 + $0x10] sm:$0xff]  ;;  %v336_v7 = vld [vmem:[#allocation7 + $0x18] sm:$0xff]  ;;  %v1114_v23 = vmov 0.0   ;;  %s684_s7 = sshll.u32 %s1097_s21, 7  ;;  %s306_s9 = scalar_lea.vmem [#allocation10], %s677_s25 }
  0x6e   : > { %316 = vadd.xlane.f32.xlu0 %v1347_v1  ;;  %v792_v5 = vpack.c.bf16 %v334_v3, %v333_v2  ;;  %v795_v8 = vpack.c.bf16 %v336_v7, %v335_v6  ;;  %v337_v9 = vld [vmem:[#allocation7 + $0x20] sm:$0xff]  ;;  %v338_v10 = vld [vmem:[#allocation7 + $0x28] sm:$0xff]  ;;  %v339_v12 = vld [vmem:[#allocation7 + $0x30] sm:$0xff]  ;;  %753 = vmatprep.mubr.msk.f32.mxu0 %vm1113_vm0, %v1114_v23  ;;  %s554_s11 = sshll.u32 %s306_s9, 4  ;;  %s1380_s14 = scalar_lea.hbm %s1434_s5, %s684_s7  ;;  %s1382_s11 = int_to_ptr.vmem [resolvable:$true] %s554_s11 }
  0x6f   : > { %v798_v11 = vpack.c.bf16 %v338_v10, %v337_v9  ;;  %v340_v13 = vld [vmem:[#allocation7 + $0x38] sm:$0xff]  ;;  %v341_v15 = vld [vmem:[#allocation7 + $0x40] sm:$0xff]  ;;  %v342_v16 = vld [vmem:[#allocation7 + $0x48] sm:$0xff]  ;;  %788 = vmatprep.mubr.msk.f32.mxu1 %vm1113_vm0, %v1114_v23  ;;  %s541_s10 = scalar_lea.sflag [#allocation6], %s1331_s13  ;;  %s1019_s16 = scalar_lea.vmem %s1382_s11, 128 }
  0x70   : > { %793 = vmatpush3.bf16.msra.mxu0 %v792_v5  ;;  %v801_v14 = vpack.c.bf16 %v340_v13, %v339_v12  ;;  %v804_v17 = vpack.c.bf16 %v342_v16, %v341_v15  ;;  %v343_v18 = vld [vmem:[#allocation7 + $0x50] sm:$0xff]  ;;  %v344_v19 = vld [vmem:[#allocation7 + $0x58] sm:$0xff]  ;;  %v345_v21 = vld [vmem:[#allocation7 + $0x60] sm:$0xff]  ;;  %p1020_p8 = scmp.ne.s32.totalorder %s1382_s11, %s1019_s16  ;;  %p1449_p12 = scmp.ne.s32.totalorder %s1445_s8, 0 }
  0x71   : > { %794 = vmatprep.subr.bf16.mxu0 %v1112_v0  ;;  %v807_v20 = vpack.c.bf16 %v344_v19, %v343_v18  ;;  %v346_v22 = vld [vmem:[#allocation7 + $0x68] sm:$0xff]  ;;  %v347_v25 = vld [vmem:[#allocation7 + $0x70] sm:$0xff]  ;;  %v348_v26 = vld [vmem:[#allocation7 + $0x78] sm:$0xff]  ;;  %s1115_s21 = smov [#allocation10]  }
  0x72   : > { %319 = vadd.xlane.f32.xlu0 %v318_v4  ;;  %v810_v24 = vpack.c.bf16 %v346_v22, %v345_v21  ;;  %v813_v27 = vpack.c.bf16 %v348_v26, %v347_v25  ;;  %v432_v28 = vld [vmem:[#allocation9] sm:$0xff]  ;;  %v433_v29 = vld [vmem:[#allocation9 + $0x8] sm:$0xff]  ;;  %v434_v30 = vld [vmem:[#allocation9 + $0x10] sm:$0xff]  ;;  %p1021_p1 = pnand %p1020_p8, %p1449_p12  ;;  %s1023_s25 = sshll.u32 %s1115_s21, 4  ;;  %s1024_s25 = int_to_ptr.vmem [resolvable:$false] %s1023_s25 }
  0x73   : > { %v816_v31 = vpack.c.bf16 %v433_v29, %v432_v28  ;;  %v435_v32 = vld [vmem:[#allocation9 + $0x18] sm:$0xff]  ;;  %v436_v34 = vld [vmem:[#allocation9 + $0x20] sm:$0xff]  ;;  %v437_v35 = vld [vmem:[#allocation9 + $0x28] sm:$0xff]  ;;  %s1025_s17 = scalar_lea.vmem %s1024_s25, 256  ;;  %p1026_p3 = scmp.lt.s32.totalorder %s1382_s11, %s1024_s25 }
  0x74   : > { %796 = vmatpush3.bf16.msra.mxu0 %v795_v8  ;;  %v819_v33 = vpack.c.bf16 %v435_v32, %v434_v30  ;;  %v822_v36 = vpack.c.bf16 %v437_v35, %v436_v34  ;;  %v438_v48 = vld [vmem:[#allocation9 + $0x30] sm:$0xff]  ;;  %v439_v49 = vld [vmem:[#allocation9 + $0x38] sm:$0xff]  ;;  %v440_v51 = vld [vmem:[#allocation9 + $0x40] sm:$0xff]  ;;  %p1022_p10 = pneg %p1021_p1  ;;  %p1027_p5 = scmp.lt.s32.totalorder %s1025_s17, %s1019_s16 }
  0x75   : > { %797 = vmatprep.subr.bf16.mxu0 %v1112_v0  ;;  %817 = vmatpush3.bf16.msra.mxu1 %v816_v31  ;;  %v825_v50 = vpack.c.bf16 %v439_v49, %v438_v48  ;;  %v441_v52 = vld [vmem:[#allocation9 + $0x48] sm:$0xff]  ;;  %v442_v54 = vld [vmem:[#allocation9 + $0x50] sm:$0xff]  ;;  %v443_v55 = vld [vmem:[#allocation9 + $0x58] sm:$0xff] }
  0x76   : > { %818 = vmatprep.subr.bf16.mxu1 %v1112_v0  ;;  %v828_v53 = vpack.c.bf16 %v441_v52, %v440_v51  ;;  %v831_v56 = vpack.c.bf16 %v443_v55, %v442_v54  ;;  %v444_v57 = vld [vmem:[#allocation9 + $0x60] sm:$0xff]  ;;  %v445_v58 = vld [vmem:[#allocation9 + $0x68] sm:$0xff]  ;;  %v446_v60 = vld [vmem:[#allocation9 + $0x70] sm:$0xff]  ;;  %p1028_p9 = por %p1027_p5, %p1026_p3 }
  0x77   : > { %v834_v59 = vpack.c.bf16 %v445_v58, %v444_v57  ;;  %v447_v61 = vld [vmem:[#allocation9 + $0x78] sm:$0xff]  ;;  %v681_v63 = vld [vmem:[%s1431_s2] ss:$0 sm:$0xff] }
  0x78   : > { %799 = vmatpush3.bf16.msra.mxu0 %v798_v11  ;;  %v837_v62 = vpack.c.bf16 %v447_v61, %v446_v60  ;;  %p1029_p11 = pnand %p1028_p9, %p1022_p10 }
  0x79   : > { %800 = vmatprep.subr.bf16.mxu0 %v1112_v0  ;;  %820 = vmatpush3.bf16.msra.mxu1 %v819_v33 }
  0x7a   : > { %821 = vmatprep.subr.bf16.mxu1 %v1112_v0 }
  0x7c   : > { %802 = vmatpush3.bf16.msra.mxu0 %v801_v14 }
  0x7d   : > { %803 = vmatprep.subr.bf16.mxu0 %v1112_v0  ;;  %823 = vmatpush3.bf16.msra.mxu1 %v822_v36 }
  0x7e   : > { %824 = vmatprep.subr.bf16.mxu1 %v1112_v0 }
  0x80   : > { %805 = vmatpush3.bf16.msra.mxu0 %v804_v17 }
  0x81   : > { %806 = vmatprep.subr.bf16.mxu0 %v1112_v0  ;;  %826 = vmatpush3.bf16.msra.mxu1 %v825_v50 }
  0x82   : > { %827 = vmatprep.subr.bf16.mxu1 %v1112_v0 }
  0x84   : > { %808 = vmatpush3.bf16.msra.mxu0 %v807_v20 }
  0x85   : > { %809 = vmatprep.subr.bf16.mxu0 %v1112_v0  ;;  %829 = vmatpush3.bf16.msra.mxu1 %v828_v53 }
  0x86   : > { %830 = vmatprep.subr.bf16.mxu1 %v1112_v0 }
  0x88   : > { %811 = vmatpush3.bf16.msra.mxu0 %v810_v24 }
  0x89   : > { %812 = vmatprep.subr.bf16.mxu0 %v1112_v0  ;;  %832 = vmatpush3.bf16.msra.mxu1 %v831_v56 }
  0x8a   : > { %833 = vmatprep.subr.bf16.mxu1 %v1112_v0 }
  0x8c   : > { %814 = vmatpush3.bf16.msra.mxu0 %v813_v27 }
  0x8d   : > { %835 = vmatpush3.bf16.msra.mxu1 %v834_v59 }
  0x8e   : > { %836 = vmatprep.subr.bf16.mxu1 %v1112_v0  ;;  %v682_v0 = vld [vmem:[%s1433_s4] ss:$0 sm:$0xff] }
  0x91   : > { %838 = vmatpush3.bf16.msra.mxu1 %v837_v62 }
  0xfb   : > { %v317_v37 = vpop.xlane.xlu0 %316 }
  0xfc   : > { %v321_v38 = vmul.f32 0.03125, %v317_v37 }
  0xfe   : > { %v323_v40 = vmul.f32 %v321_v38, %v321_v38  ;;  %v326_v45 = vsub.f32 %v1347_v1, %v321_v38 }
  0xff   : > { %v320_v39 = vpop.xlane.xlu0 %319 }
 0x100   : > { %v322_v41 = vmul.f32 0.03125, %v320_v39 }
 0x102   : > { %v324_v42 = vsub.f32 %v322_v41, %v323_v40 }
 0x104   : > { %v325_v43 = vmax.f32 %v324_v42, 0.0 }
 0x106   : > { %v327_v44 = vadd.f32 1e-05, %v325_v43 }
 0x108   : > { %927 = vrsqrt.f32 %v327_v44 }
 0x112   : > { %v928_v46 = vpop.eup %927 }
 0x113   : > { %v329_v47 = vmul.f32 %v928_v46, %v326_v45 }
 0x115   : > { %754 = vmatmul.mubr.f32.vlgmr.msra.gmra.mrb[0].mxu0 %v329_v47 }
 0x1e8   : > { %v422_v2 = vpop.f32.mrb[0].mxu0 }
 0x1e9   : > { %v423_v3 = vadd.f32 %v681_v63, %v422_v2  ;;  %v755_v4 = vpop.f32.mrb[1].mxu0 }
 0x1eb   : > { %v427_v5 = vmul.f32 0.70710677, %v423_v3  ;;  %v426_v7 = vmul.f32 0.5, %v423_v3 }
 0x1ed   : > { %929 = verf.f32 %v427_v5 }
 0x1f7   : > { %v930_v6 = vpop.eup %929 }
 0x1f8   : > { %v429_v8 = vadd.f32 1.0, %v930_v6 }
 0x1fa   : > { %v430_v9 = vmul.f32 %v429_v8, %v426_v7 }
 0x1fc   : > { %789 = vmatmul.mubr.f32.vlgmr.msra.gmra.mrb[0].mxu1 %v430_v9 }
 0x2cf   : > { %v514_v10 = vpop.f32.mrb[0].mxu1 }
 0x2d0   : > { %v531_v11 = vadd.f32 %v682_v0, %v514_v10  ;;  %v790_v12 = vpop.f32.mrb[1].mxu1 }
 0x2d2   : > { %v533_v13 = vmul.f32 0.70710677, %v531_v11  ;;  %v532_v15 = vmul.f32 0.5, %v531_v11 }
 0x2d4   : > { %931 = verf.f32 %v533_v13 }
 0x2de   : > { %v932_v14 = vpop.eup %931 }
 0x2df   : > { %v535_v16 = vadd.f32 1.0, %v932_v14 }
 0x2e1   : > { %v536_v17 = vmul.f32 %v535_v16, %v532_v15 }
 0x2e3   : > { %v538_v18 = vadd.f32 %v536_v17, %v1347_v1 }
 0x2e5   : > { %539 = vst [vmem:[%s306_s9] sm:$0xff] %v538_v18 }
 0x2e6   : > { %1032 = shalt.err (!%p1029_p11)
}
 0x2e7   : > { %s1033_s13 = scalar_lea.hbm %s1380_s14, 128  ;;  %s1037_s30 = scalar_lea.hbm %s1434_s5, 256 }
 0x2e8   : > { %p1034_p0 = scmp.ne.s32.totalorder %s1380_s14, %s1033_s13  ;;  %p1038_p6 = scmp.lt.u32.totalorder %s1380_s14, %s1434_s5 }
 0x2e9   : > { %p1039_p7 = scmp.lt.u32.totalorder %s1037_s30, %s1033_s13  ;;  %p1041_p8 = scmp.lt.u32.totalorder %s1033_s13, %s1380_s14 }
 0x2ea   : > { %p1035_p4 = pnand %p1034_p0, %p1449_p12 }
 0x2eb   : > { %p1040_p2 = por %p1039_p7, %p1038_p6 }
 0x2ec   : > { %p1036_p13 = pneg %p1035_p4 }
 0x2ed   : > { %p1042_p1 = por %p1041_p8, %p1040_p2 }
 0x2ef   : > { %p1043_p10 = pnand %p1042_p1, %p1036_p13 }
 0x2f1   : > { %1046 = shalt.err (!%p1043_p10)
}
 0x2f2   : > { %849 = dma.vmem_to_hbm [thread:$0]  (%p1449_p12), %s1382_s11, 128, %s1380_s14, %s541_s10  }
 0x2f3 PF: > { %s566_s9 = sand.u32 1, %s1085_s18   ;;  %p1450_p3 = scmp.ne.s32.totalorder %s1442_s29, 0 }
 0x2f4   : > { %p1451_p5 = scmp.ge.s32.totalorder %s1105_s23, 2  ;;  %s567_s15 = scalar_lea.sflag [#allocation6], %s566_s9 }
 0x2f6   : > { %p863_p9 = pnand %p1451_p5, %p1450_p3 }
 0x2f8   : > { %1080 = dma.done.wait (!%p863_p9), %s567_s15, 128  }
 0x2f9   : > { %1082 = vsyncadd (!%p863_p9), %s567_s15, 4294967168  ;;  %s22_s23 = sadd.s32 1, %s1105_s23   ;;  %s1452_s18 = smov %s1089_s19 }
 0x2fa   : > { %p19_p11 = scmp.ge.s32.totalorder %s22_s23, 4   ;;  %s1453_s19 = smov %s1093_s20 }
 0x2fb   : > { %s1454_s20 = smov %s1288_s6  ;;  %s1455_s21 = smov %s1101_s22 }
 0x2fc   : > { %s1456_s22 = smov %s1458_s12  ;;  %21 = sbr.rel (!%p19_p11) target bundleno = 7 (0x7), region = 106 }
 0x303   :  { %572 = vsyncpa [#allocation5], 1 }
 0x304   :  { %574 = vsyncpa [#allocation5 + $0x1], 1 }
 0x305   :  { %575 = vsyncpa [#allocation8], 1 }
 0x306   :  { %576 = vsyncpa [#allocation6], 1 }
 0x307   :  { %578 = vsyncpa [#allocation6 + $0x1], 1 }

</bundles_post_ra>
